<compile_context>
chip_gen: v7x
topology: tpu7x:2x2x1
jax: 0.10.0
libtpu: 0.0.40
codegen_flags: <defaults>
</compile_context>

<pallas_src>
import math

import jax
import jax.numpy as jnp
from jax.experimental import pallas as pl
from jax.experimental.pallas import tpu as pltpu


def _round_up(v: int, m: int) -> int:
    return ((v + m - 1) // m) * m


def _pick_tile(dim: int, max_tile: int, granule: int):
    """Tile for `dim`: a multiple of `granule`, <= max_tile, that divides the
    granule-padded dim (never inflates work by rounding the dim up to the
    tile size).  Returns (tile, padded_dim)."""
    dim_p = _round_up(max(int(dim), 1), granule)
    max_tile = max(granule, (int(max_tile) // granule) * granule)
    best = granule
    t = granule
    while t <= min(max_tile, dim_p):
        if dim_p % t == 0:
            best = t
        t += granule
    return best, dim_p


def _tpu_tile_defaults():
    """Per-generation tile caps and scoped-VMEM limit, keyed off VMEM size."""
    vmem_cap = 64 * 1024 * 1024
    try:
        vmem_cap = int(pltpu.get_tpu_info().vmem_capacity_bytes)
    except Exception:
        pass
    if vmem_cap >= 100 * 1024 * 1024:
        # v5e / v6e: 128 MiB VMEM.  Larger tiles keep big shapes MXU-bound and
        # amortize the ~0.35 us/step grid overhead (bf16 footprint ~12-16 MiB).
        return 512, 1024, 1024, 80 * 1024 * 1024
    # v7x: 64 MiB per-TC VMEM.  Keep the footprint well under ~48 MiB and
    # leave the rest as pipelining headroom.
    return 512, 512, 512, 48 * 1024 * 1024


def _monotonic_kernel(x_ref, w_ref, b_ref, o_ref, acc_ref):
    # Grid = (M tiles, N tiles, K tiles); K (reduction) is the innermost axis.
    k = pl.program_id(2)

    @pl.when(k == 0)
    def _():
        acc_ref[...] = jnp.zeros_like(acc_ref)

    # Pure MXU accumulate: weights arrive pre-transformed (sign * exp) and
    # pre-transposed to (K, N) from the wrapper -- no in-kernel transpose,
    # transcendental or sign broadcast.
    acc_ref[...] += jnp.dot(x_ref[...], w_ref[...],
                            preferred_element_type=jnp.float32)

    # Bias add + dtype cast only in the finalize branch.
    @pl.when(k == pl.num_programs(2) - 1)
    def _():
        o_ref[...] = (acc_ref[...] + b_ref[...]).astype(o_ref.dtype)


def monotonic_linear(x, weights, biases, increasing, *,
                     compute_dtype=jnp.bfloat16,
                     tile_m=None, tile_n=None, tile_k=None):
    """MonotonicLinear forward.

    x:          (B, in_features)
    weights:    (G, out_features, in_features)
    biases:     (G, out_features)
    increasing: bools, shape (in_features,) shared or (G, in_features) per group
    Returns (G, B, out_features), matching
      torch.cat([g(x) for g in groups], dim=0).reshape(G, B, out_features).
    """
    B, in_f = x.shape
    G, out_f, in_f2 = weights.shape
    assert in_f2 == in_f and biases.shape == (G, out_f)

    out_dtype = x.dtype
    N = G * out_f

    # ---- trace-time preprocessing (runs once in XLA, not per M tile) -------
    inc = jnp.asarray(increasing, dtype=bool)
    sign = jnp.where(inc, 1.0, -1.0).astype(jnp.float32)
    sign = sign[None, None, :] if sign.ndim == 1 else sign[:, None, :]
    # f32 exp (matches the PyTorch reference), then compute dtype for the MXU.
    w_eff = sign * jnp.exp(weights.astype(jnp.float32))           # (G, out, in)
    w_t = w_eff.reshape(N, in_f).T.astype(compute_dtype)          # (K, N)
    b_all = biases.reshape(1, N).astype(jnp.float32)              # (1, N)
    x_c = x.astype(compute_dtype)

    # ---- hardware-minimum padding + zero-waste tile selection --------------
    d_m, d_n, d_k, vmem_limit = _tpu_tile_defaults()
    tile_m = d_m if tile_m is None else tile_m
    tile_n = d_n if tile_n is None else tile_n
    tile_k = d_k if tile_k is None else tile_k

    m_granule = 16 if jnp.dtype(compute_dtype).itemsize < 4 else 8
    tm, M_p = _pick_tile(B, tile_m, m_granule)
    tn, N_p = _pick_tile(N, tile_n, 128)
    tk, K_p = _pick_tile(in_f, tile_k, 128)

    # Megacore (v7x has 2 TensorCores): if the parallel (M, N) part of the
    # grid collapses to a single tile, split M so both cores get work.
    if (M_p // tm) * (N_p // tn) == 1 and M_p >= 2 * m_granule:
        tm, M_p = _pick_tile(B, M_p // 2, m_granule)

    # Zero padding: padded K rows of x AND w are zero -> contribute nothing to
    # the dot; padded M rows / N cols are sliced off below.
    x_p = jnp.zeros((M_p, K_p), compute_dtype).at[:B, :in_f].set(x_c)
    w_p = jnp.zeros((K_p, N_p), compute_dtype).at[:in_f, :N].set(w_t)
    b_p = jnp.zeros((1, N_p), jnp.float32).at[:, :N].set(b_all)

    grid = (M_p // tm, N_p // tn, K_p // tk)

    y_p = pl.pallas_call(
        _monotonic_kernel,
        out_shape=jax.ShapeDtypeStruct((M_p, N_p), out_dtype),
        grid_spec=pltpu.PrefetchScalarGridSpec(
            num_scalar_prefetch=0,
            grid=grid,
            in_specs=[
                pl.BlockSpec((tm, tk), lambda i, j, k: (i, k)),   # x
                pl.BlockSpec((tk, tn), lambda i, j, k: (k, j)),   # w_eff (K, N)
                pl.BlockSpec((1, tn), lambda i, j, k: (0, j)),    # bias (per-N)
            ],
            out_specs=pl.BlockSpec((tm, tn), lambda i, j, k: (i, j)),
            scratch_shapes=[pltpu.VMEM((tm, tn), jnp.float32)],
        ),
        compiler_params=pltpu.CompilerParams(
            dimension_semantics=("parallel", "parallel", "arbitrary"),
            vmem_limit_bytes=vmem_limit,
        ),
    )(x_p, w_p, b_p)

    y = y_p[:B, :N]                                     # (B, G*out)
    return y.reshape(B, G, out_f).transpose(1, 0, 2)    # (G, B, out)


if __name__ == "__main__":
    # Small shapes consistent with the module: G groups of a plain linear layer.
    G = 3
    batch = 8
    in_features = 16
    out_features = 32

    key = jax.random.PRNGKey(0)
    k_x, k_w, k_b, k_i = jax.random.split(key, 4)

    # Deterministic parameter init mimicking the PyTorch shapes/ranges.
    bound_w = math.sqrt(6.0 / in_features) / math.sqrt(1.0 + 5.0)  # kaiming_uniform(a=sqrt(5))
    bound_b = 1.0 / math.sqrt(in_features)
    weights = jax.random.uniform(
        k_w, (G, out_features, in_features), jnp.float32, -bound_w, bound_w
    )
    biases = jax.random.uniform(k_b, (G, out_features), jnp.float32, -bound_b, bound_b)
    x = jax.random.normal(k_x, (batch, in_features), jnp.float32)
    # Per-group monotonicity directions (each MonotonicGroup has its own list).
    increasing = jax.random.bernoulli(k_i, 0.5, (G, in_features))

    y = monotonic_linear(x, weights, biases, increasing)
    y = jax.block_until_ready(y)
    assert y.shape == (G, batch, out_features), y.shape

    # Pure-JAX references.
    sign = jnp.where(increasing, 1.0, -1.0).astype(jnp.float32)
    w_eff = sign[:, None, :] * jnp.exp(weights)                      # (G, out, in)
    # Full-f32 reference (PyTorch semantics).
    y_f32 = jnp.einsum("bi,goi->gbo", x, w_eff) + biases[:, None, :]
    # Same-precision reference (bf16-rounded MXU operands, f32 accumulation).
    x_b = x.astype(jnp.bfloat16).astype(jnp.float32)
    w_b = w_eff.astype(jnp.bfloat16).astype(jnp.float32)
    y_b = jnp.einsum("bi,goi->gbo", x_b, w_b) + biases[:, None, :]

    assert jnp.allclose(y, y_b, atol=1e-3, rtol=1e-3), "mismatch vs same-precision reference"
    assert jnp.allclose(y, y_f32, atol=1e-1, rtol=1e-1), "mismatch vs f32 reference"
    print("KERNEL_OK")
</pallas_src>

<mosaic_0001>
module attributes {stable_mosaic.version = 11 : i64} {
  func.func @_monotonic_kernel(%arg0: i32, %arg1: i32, %arg2: i32, %arg3: memref<16x128xbf16, #tpu.memory_space<vmem>>, %arg4: memref<128x128xbf16, #tpu.memory_space<vmem>>, %arg5: memref<1x128xf32, #tpu.memory_space<vmem>>, %arg6: memref<16x128xf32, #tpu.memory_space<vmem>>, %arg7: memref<16x128xf32, #tpu.memory_space<vmem>>) attributes {dimension_semantics = [#tpu.dimension_semantics<parallel>, #tpu.dimension_semantics<parallel>, #tpu.dimension_semantics<arbitrary>], iteration_bounds = array<i64: 1, 1, 1>, scalar_prefetch = 0 : i64, scratch_operands = 1 : i64, tpu.core_type = #tpu.core_type<tc>, window_params = [{transform_indices = @transform_0, window_bounds = array<i64: 16, 128>}, {transform_indices = @transform_1, window_bounds = array<i64: 128, 128>}, {transform_indices = @transform_2, window_bounds = array<i64: 1, 128>}, {transform_indices = @transform_3, window_bounds = array<i64: 16, 128>}]} {
    %c0_i32 = arith.constant 0 : i32
    %0 = arith.cmpi eq, %arg2, %c0_i32 : i32
    %1 = arith.extui %0 : i1 to i32
    %c0_i32_0 = arith.constant 0 : i32
    %2 = arith.cmpi ne, %1, %c0_i32_0 : i32
    scf.if %2 {
      %cst_10 = arith.constant 0.000000e+00 : f32
      %12 = vector.broadcast %cst_10 : f32 to vector<16x128xf32>
      %c0_11 = arith.constant 0 : index
      %c0_12 = arith.constant 0 : index
      %13 = vector.load %arg7[%c0_11, %c0_12] : memref<16x128xf32, #tpu.memory_space<vmem>>, vector<16x128xf32>
      tpu.vector_store %arg7[%c0_11, %c0_12], %12 {strides = array<i32>} : memref<16x128xf32, #tpu.memory_space<vmem>>, vector<16x128xf32>,
    } else {
    }
    %c0 = arith.constant 0 : index
    %c0_1 = arith.constant 0 : index
    %3 = vector.load %arg7[%c0, %c0_1] : memref<16x128xf32, #tpu.memory_space<vmem>>, vector<16x128xf32>
    %c0_2 = arith.constant 0 : index
    %c0_3 = arith.constant 0 : index
    %4 = vector.load %arg3[%c0_2, %c0_3] : memref<16x128xbf16, #tpu.memory_space<vmem>>, vector<16x128xbf16>
    %c0_4 = arith.constant 0 : index
    %c0_5 = arith.constant 0 : index
    %5 = vector.load %arg4[%c0_4, %c0_5] : memref<128x128xbf16, #tpu.memory_space<vmem>>, vector<128x128xbf16>
    %cst = arith.constant dense<0.000000e+00> : vector<16x128xf32>
    %6 = tpu.matmul %4, %5, %cst {dimension_numbers = #tpu.dot_dimension_numbers<[1], [0], [0], [1], [0, 0, 1, 1], [], []>} : vector<16x128xbf16>, vector<128x128xbf16>, vector<16x128xf32> -> vector<16x128xf32>
    %7 = arith.addf %3, %6 : vector<16x128xf32>
    %c0_6 = arith.constant 0 : index
    %c0_7 = arith.constant 0 : index
    %8 = vector.load %arg7[%c0_6, %c0_7] : memref<16x128xf32, #tpu.memory_space<vmem>>, vector<16x128xf32>
    tpu.vector_store %arg7[%c0_6, %c0_7], %7 {strides = array<i32>} : memref<16x128xf32, #tpu.memory_space<vmem>>, vector<16x128xf32>,
    %c0_i32_8 = arith.constant 0 : i32
    %9 = arith.cmpi eq, %arg2, %c0_i32_8 : i32
    %10 = arith.extui %9 : i1 to i32
    %c0_i32_9 = arith.constant 0 : i32
    %11 = arith.cmpi ne, %10, %c0_i32_9 : i32
    scf.if %11 {
      %c0_10 = arith.constant 0 : index
      %c0_11 = arith.constant 0 : index
      %12 = vector.load %arg7[%c0_10, %c0_11] : memref<16x128xf32, #tpu.memory_space<vmem>>, vector<16x128xf32>
      %c0_12 = arith.constant 0 : index
      %c0_13 = arith.constant 0 : index
      %13 = vector.load %arg5[%c0_12, %c0_13] : memref<1x128xf32, #tpu.memory_space<vmem>>, vector<1x128xf32>
      %14 = vector.broadcast %13 : vector<1x128xf32> to vector<16x128xf32>
      %15 = arith.addf %12, %14 : vector<16x128xf32>
      %c0_14 = arith.constant 0 : index
      %c0_15 = arith.constant 0 : index
      %16 = vector.load %arg6[%c0_14, %c0_15] : memref<16x128xf32, #tpu.memory_space<vmem>>, vector<16x128xf32>
      tpu.vector_store %arg6[%c0_14, %c0_15], %15 {strides = array<i32>} : memref<16x128xf32, #tpu.memory_space<vmem>>, vector<16x128xf32>,
    } else {
    }
    return
  }
  func.func @transform_0(%arg0: i32, %arg1: i32, %arg2: i32) -> (i32, i32) {
    %c0_i32 = arith.constant 0 : i32
    return %arg0, %arg2 : i32, i32
  }
  func.func @transform_1(%arg0: i32, %arg1: i32, %arg2: i32) -> (i32, i32) {
    %c0_i32 = arith.constant 0 : i32
    return %arg2, %arg1 : i32, i32
  }
  func.func @transform_2(%arg0: i32, %arg1: i32, %arg2: i32) -> (i32, i32) {
    %c0_i32 = arith.constant 0 : i32
    %c0_i32_0 = arith.constant 0 : i32
    return %c0_i32, %arg1 : i32, i32
  }
  func.func @transform_3(%arg0: i32, %arg1: i32, %arg2: i32) -> (i32, i32) {
    %c0_i32 = arith.constant 0 : i32
    return %arg0, %arg1 : i32, i32
  }
}

</mosaic_0001>

<bundles_post_ra>
// kernel: tpu_custom_call.1
= control target key start
LH: loop header
LB: loop body
LE: loop exit
PB: predicated region body
PF: predicated region fallthrough
CT: control target
= control target key end

     0   :  { %8 = vsyncpa [#allocation4], 0  ;;  %s400_s0 = inlined_call_operand.hbm [shape: bf16[16,128], index: 0, kind: input, shape index: {}]   ;;  %s401_s1 = inlined_call_operand.hbm [shape: bf16[128,128], index: 1, kind: input, shape index: {}]   ;;  %s402_s2 = inlined_call_operand.vmem [shape: f32[1,128], index: 2, kind: input, shape index: {}]   ;;  %s403_s3 = inlined_call_operand.hbm [shape: f32[16,128], index: 3, kind: output, shape index: {}]  }
   0x1   :  { %9 = vsyncpa [#allocation7], 0 }
   0x2   :  { %10 = vsyncpa [#allocation5], 0  ;;  %s332_s12 = smov [#allocation3]   ;;  %s260_s16 = scalar_lea.hbm %s400_s0, 128 }
   0x3   :  { %s16_s13 = sshll.u32 %s332_s12, 4  ;;  %p261_p0 = scmp.ne.s32.totalorder %s400_s0, %s260_s16  ;;  %s17_s13 = int_to_ptr.vmem [resolvable:$true] %s16_s13 }
   0x4   :  { %p264_p1 = scmp.lt.u32.totalorder %s260_s16, %s400_s0 }
   0x6   :  { %p266_p2 = pnand %p264_p1, %p261_p0 }
   0x8   :  { %269 = shalt.err (!%p266_p2)
}
   0x9   :  { %s270_s21 = scalar_lea.vmem %s17_s13, 128  ;;  %p275_p4 = scmp.lt.s32.totalorder %s17_s13, %s17_s13 }
   0xa   :  { %p271_p3 = scmp.ne.s32.totalorder %s17_s13, %s270_s21  ;;  %p276_p5 = scmp.lt.s32.totalorder %s270_s21, %s270_s21 }
   0xc   :  { %p277_p6 = por %p276_p5, %p275_p4 }
   0xe   :  { %p278_p7 = pnand %p277_p6, %p271_p3 }
  0x10   :  { %281 = shalt.err (!%p278_p7)
}
  0x11   :  { %s333_s22 = smov 64   ;;  %s334_s23 = smov 4  }
  0x12   :  { %22 = dma.hbm_to_vmem [thread:$0]  %s400_s0, 128, %s17_s13, [#allocation4], %s333_s22, %s333_s22, %s334_s23  }
  0x13   :  { %s335_s26 = smov [#allocation6]   ;;  %s282_s30 = scalar_lea.hbm %s401_s1, 1024 }
  0x14   :  { %s28_s27 = sshll.u32 %s335_s26, 4  ;;  %p283_p8 = scmp.ne.s32.totalorder %s401_s1, %s282_s30  ;;  %s29_s27 = int_to_ptr.vmem [resolvable:$true] %s28_s27 }
  0x15   :  { %p286_p9 = scmp.lt.u32.totalorder %s282_s30, %s401_s1 }
  0x17   :  { %p288_p10 = pnand %p286_p9, %p283_p8 }
  0x19   :  { %291 = shalt.err (!%p288_p10)
}
  0x1a   :  { %s292_s8 = scalar_lea.vmem %s29_s27, 1024  ;;  %p297_p12 = scmp.lt.s32.totalorder %s29_s27, %s29_s27 }
  0x1b   :  { %p293_p11 = scmp.ne.s32.totalorder %s29_s27, %s292_s8  ;;  %p298_p13 = scmp.lt.s32.totalorder %s292_s8, %s292_s8 }
  0x1d   :  { %p299_p0 = por %p298_p13, %p297_p12 }
  0x1f   :  { %p300_p1 = pnand %p299_p0, %p293_p11 }
  0x21   :  { %303 = shalt.err (!%p300_p1)
}
  0x22   :  { %34 = dma.hbm_to_vmem [thread:$0]  %s401_s1, 1024, %s29_s27, [#allocation7], %s333_s22, %s333_s22, %s334_s23  }
  0x23   :  { %326 = dma.done.wait [#allocation4], 128  }
  0x24   :  { %327 = vsyncadd [#allocation4], 4294967168 }
  0x25   :  { %328 = dma.done.wait [#allocation7], 1024  }
  0x26   :  { %329 = vsyncadd [#allocation7], 4294966272  ;;  %v336_v0 = vmov 0.0   ;;  %vm337_vm0 = vmmov 0   ;;  %v251_v1 = vld [vmem:[#allocation6] sm:$0xff]   ;;  %v252_v2 = vld [vmem:[#allocation6 + $0x8] sm:$0xff]  }
  0x27   :  { %222 = vmatprep.subr.bf16.mxu0 %v336_v0  ;;  %238 = vmatprep.mubr.msk.bf16.mxu0 %vm337_vm0, %v336_v0  ;;  %v253_v3 = vld [vmem:[#allocation6 + $0x10] sm:$0xff]   ;;  %v254_v4 = vld [vmem:[#allocation6 + $0x18] sm:$0xff]   ;;  %v255_v5 = vld [vmem:[#allocation6 + $0x20] sm:$0xff]   ;;  %s338_s11 = smov [#allocation8]  }
  0x28   :  { %223 = vmatpush3.bf16.msra.mxu0 %v251_v1  ;;  %v256_v6 = vld [vmem:[#allocation6 + $0x28] sm:$0xff]   ;;  %v257_v7 = vld [vmem:[#allocation6 + $0x30] sm:$0xff]   ;;  %v258_v8 = vld [vmem:[#allocation6 + $0x38] sm:$0xff]   ;;  %s190_s12 = sshll.u32 %s338_s11, 4  ;;  %s191_s12 = int_to_ptr.vmem [resolvable:$true] %s190_s12 }
  0x29   :  { %224 = vmatprep.subr.bf16.mxu0 %v336_v0  ;;  %v259_v9 = vld [vmem:[#allocation3] sm:$0xff]   ;;  %s304_s13 = scalar_lea.vmem %s191_s12, 256  ;;  %p309_p3 = scmp.lt.s32.totalorder %s191_s12, %s191_s12 }
  0x2a   :  { %v212_v10 = vld [vmem:[%s402_s2] ss:$0 sm:$0xff]  ;;  %p305_p2 = scmp.ne.s32.totalorder %s191_s12, %s304_s13  ;;  %p310_p4 = scmp.lt.s32.totalorder %s304_s13, %s304_s13 }
  0x2c   :  { %225 = vmatpush3.bf16.msra.mxu0 %v252_v2  ;;  %p311_p5 = por %p310_p4, %p309_p3 }
  0x2d   :  { %226 = vmatprep.subr.bf16.mxu0 %v336_v0 }
  0x2e   :  { %p312_p6 = pnand %p311_p5, %p305_p2 }
  0x30   :  { %227 = vmatpush3.bf16.msra.mxu0 %v253_v3 }
  0x31   :  { %228 = vmatprep.subr.bf16.mxu0 %v336_v0 }
  0x34   :  { %229 = vmatpush3.bf16.msra.mxu0 %v254_v4 }
  0x35   :  { %230 = vmatprep.subr.bf16.mxu0 %v336_v0 }
  0x38   :  { %231 = vmatpush3.bf16.msra.mxu0 %v255_v5 }
  0x39   :  { %232 = vmatprep.subr.bf16.mxu0 %v336_v0 }
  0x3c   :  { %233 = vmatpush3.bf16.msra.mxu0 %v256_v6 }
  0x3d   :  { %234 = vmatprep.subr.bf16.mxu0 %v336_v0 }
  0x40   :  { %235 = vmatpush3.bf16.msra.mxu0 %v257_v7 }
  0x41   :  { %236 = vmatprep.subr.bf16.mxu0 %v336_v0 }
  0x44   :  { %237 = vmatpush3.bf16.msra.mxu0 %v258_v8 }
  0x47   :  { %239 = vmatmul.mubr.bf16.vlgmr.msra.gmra.mrb[0].mxu0 %v259_v9 }
 0x11a   :  { %v158_v11 = vpop.f32.mrb[0].mxu0 }
 0x11b   :  { %v181_v12 = vadd.f32 %v212_v10, %v158_v11  ;;  %v240_v13 = vpop.f32.mrb[1].mxu0 }
 0x11c   :  { %v161_v14 = vpop.f32.mrb[2].mxu0 }
 0x11d   :  { %183 = vst [vmem:[#allocation8] sm:$0xff] %v181_v12  ;;  %v182_v15 = vadd.f32 %v212_v10, %v161_v14  ;;  %v241_v16 = vpop.f32.mrb[3].mxu0 }
 0x11f   :  { %184 = vst [vmem:[#allocation8 + $0x8] sm:$0xff] %v182_v15 }
 0x120   :  { %315 = shalt.err (!%p312_p6)
}
 0x121   :  { %s316_s15 = scalar_lea.hbm %s403_s3, 256 }
 0x122   :  { %p317_p7 = scmp.ne.s32.totalorder %s403_s3, %s316_s15  ;;  %p320_p8 = scmp.lt.u32.totalorder %s316_s15, %s403_s3 }
 0x124   :  { %p322_p9 = pnand %p320_p8, %p317_p7 }
 0x126   :  { %325 = shalt.err (!%p322_p9)
}
 0x127   :  { %s339_s20 = smov 128   ;;  %s340_s21 = smov 8  }
 0x128   :  { %196 = dma.vmem_to_hbm [thread:$0]  %s191_s12, 256, %s403_s3, [#allocation5], %s339_s20, %s339_s20, %s340_s21  }
 0x129   :  { %330 = dma.done.wait [#allocation5], 256  }
 0x12a   :  { %331 = vsyncadd [#allocation5], 4294967040 }
 0x12b   :  { %200 = vsyncpa [#allocation4], 1 }
 0x12c   :  { %201 = vsyncpa [#allocation7], 1 }
 0x12d   :  { %202 = vsyncpa [#allocation5], 1 }

</bundles_post_ra>
